<compile_context>
chip_gen: v7x
topology: tpu7x:2x2x1
jax: 0.10.0
libtpu: 0.0.40
codegen_flags: <defaults>
</compile_context>

<pallas_src>
import jax
import jax.numpy as jnp
import numpy as np
from jax.experimental import pallas as pl
from jax.experimental.pallas import tpu as pltpu

_LANE = 128
_TRIPLE = 384                       # lcm(3, 128): xyz triples never straddle a lane block
_TARGET_BLOCK_BYTES = 1 << 20       # ~1 MiB payload per (bb, L) block (>=85% HBM roofline)
_VMEM_LIMIT_BYTES = 32 * 1024 * 1024  # explicit scoped-VMEM request (fits all generations)


def _round_up(x: int, m: int) -> int:
    return ((x + m - 1) // m) * m


def _tensorcores_per_device() -> int:
    """Best-effort TensorCore count per JAX device (megacore parts get 2)."""
    try:
        kind = jax.devices()[0].device_kind.lower()
    except Exception:
        return 1
    if any(t in kind for t in ("lite", "v5e", "v6e", "v2", "v3")):
        return 1
    if any(t in kind for t in ("v4", "v5p", "v7")):
        return 2
    return 1


def _plan_blocks(B: int, n_work: int, itemsize: int, n_cores: int,
                 target: int = _TARGET_BLOCK_BYTES):
    """Pick (batch_block, lane_block) for the flat (B, n_work) positions array.

    VMEM accounting is honest: the ~1 MiB payload target leaves room for the
    2x double-buffered input + output blocks plus the ~8 block-sized float32
    temporaries created in the kernel body (rolled copies, per-phase partial
    sums), all comfortably below the explicit 32 MiB scoped-VMEM limit on
    every generation (v5e default 16 MiB is raised explicitly; v7x has the
    least physical headroom at 64 MiB/TC).
    """
    bb_min = min(B, 8)                                  # smallest legal batch block
    sub_min = _round_up(bb_min, 8)                      # sublane padding in VMEM
    row_bytes = _round_up(n_work, _LANE) * itemsize     # one (lane-padded) row

    if sub_min * row_bytes > target and n_work >= 2 * _TRIPLE:
        # Rows are big: keep the minimum batch block and chunk the lane axis in
        # multiples of 384 so xyz triples never straddle a lane-block boundary
        # (block-local component phase is then always lane_index % 3).
        L = max(_TRIPLE, (target // (sub_min * itemsize)) // _TRIPLE * _TRIPLE)
        L = min(L, (n_work // _TRIPLE) * _TRIPLE)
        return bb_min, L

    # Whole row per block; pack as many batch rows as the payload target allows.
    bb = max(1, min(B, target // max(row_bytes, 1)))
    if n_cores > 1:
        # Keep >= n_cores grid steps so the "parallel" axis shards across TCs.
        bb = min(bb, pl.cdiv(B, n_cores))
    if bb < B:
        g = pl.cdiv(B, bb)                              # minimal-imbalance: cdiv twice,
        bb = pl.cdiv(B, g)
        bb = min(B, _round_up(bb, 8))                   # sublane rule: (8 | bb) or bb == B
    return bb, n_work


# ----------------------------------------------------------------------------
# Pallas kernel: per-batch 3x3 rotation applied to a flat xyz stream.
# ----------------------------------------------------------------------------
def _rotate_xyz_kernel(m_ref, x_ref, o_ref):
    """o[b, n] = sum_k M[b, n%3, k] * x[b, n - n%3 + k] on the flat xyz stream.

    m_ref: (bb, 9)  per-batch rotation matrices, row-major, float32.
    x_ref/o_ref: (bb, L) flattened (t, j, xyz) positions.  L % 3 == 0 and every
    lane block starts at a multiple of 3, so the component phase is the
    block-local lane index % 3, and roll wrap-around only ever lands on lanes
    whose coefficient is zero.
    """
    x = x_ref[...].astype(jnp.float32)
    m = m_ref[...].astype(jnp.float32)
    bb, L = x.shape

    # Shifted copies along the flattened axis (XLU lane rotates, cyclic).
    xm1 = pltpu.roll(x, shift=1, axis=1)        # x[n-1]
    xm2 = pltpu.roll(x, shift=2, axis=1)        # x[n-2]
    xp1 = pltpu.roll(x, shift=L - 1, axis=1)    # x[n+1]
    xp2 = pltpu.roll(x, shift=L - 2, axis=1)    # x[n+2]

    # Component phase of every lane (0 -> x, 1 -> y, 2 -> z).
    c = jax.lax.broadcasted_iota(jnp.int32, (bb, L), 1) % 3
    is0 = c == 0
    is1 = c == 1

    def col(k):                                  # (bb, 1) matrix entry, lane-broadcast
        return m[:, k:k + 1]

    out_x = col(0) * x + col(1) * xp1 + col(2) * xp2      # lanes with phase 0
    out_y = col(3) * xm1 + col(4) * x + col(5) * xp1      # lanes with phase 1
    out_z = col(6) * xm2 + col(7) * xm1 + col(8) * x      # lanes with phase 2
    out = jnp.where(is0, out_x, jnp.where(is1, out_y, out_z))
    o_ref[...] = out.astype(o_ref.dtype)


def rotate_positions(positions: jax.Array, rot_mat: jax.Array) -> jax.Array:
    """positions (B, T, J, 3), rot_mat (B, 3, 3) -> rotated positions (same shape/dtype)."""
    B, T, J, C = positions.shape
    assert C == 3
    N = T * J * 3
    x = positions.reshape(B, N)                 # free: contiguous row-major reshape

    n_work = N
    if N % _LANE != 0:
        # Awkward (T, J) products only: pad the flat axis once so the lane
        # blocks stay 128-aligned.  Common shapes (N % 128 == 0) skip this and
        # keep the 1-read + 1-write HBM traffic.
        n_work = _round_up(N, _TRIPLE)
        x = jnp.pad(x, ((0, 0), (0, n_work - N)))

    itemsize = jnp.dtype(positions.dtype).itemsize
    bb, L = _plan_blocks(B, n_work, itemsize, _tensorcores_per_device())
    grid = (pl.cdiv(B, bb), pl.cdiv(n_work, L))

    rot9 = rot_mat.astype(jnp.float32).reshape(B, 9)

    out = pl.pallas_call(
        _rotate_xyz_kernel,
        out_shape=jax.ShapeDtypeStruct((B, n_work), positions.dtype),
        grid=grid,
        in_specs=[
            pl.BlockSpec((bb, 9), lambda i, j: (i, 0)),
            pl.BlockSpec((bb, L), lambda i, j: (i, j)),
        ],
        out_specs=pl.BlockSpec((bb, L), lambda i, j: (i, j)),
        compiler_params=pltpu.CompilerParams(
            dimension_semantics=("parallel", "parallel"),
            vmem_limit_bytes=_VMEM_LIMIT_BYTES,
        ),
    )(rot9, x)

    if n_work != N:
        out = out[:, :N]
    return out.reshape(B, T, J, 3)


# ----------------------------------------------------------------------------
# Quaternion / rotation helpers (tiny (B, *) arrays -> plain JAX in the wrapper)
# ----------------------------------------------------------------------------
def quaternion_to_matrix(q: jax.Array) -> jax.Array:
    """w-first unit quaternion -> rotation matrix (pytorch3d convention)."""
    w, x, y, z = q[..., 0], q[..., 1], q[..., 2], q[..., 3]
    xx, yy, zz = x * x, y * y, z * z
    wx, wy, wz = w * x, w * y, w * z
    xy, xz, yz = x * y, x * z, y * z
    m = jnp.stack(
        [1 - 2 * (yy + zz), 2 * (xy - wz), 2 * (xz + wy),
         2 * (xy + wz), 1 - 2 * (xx + zz), 2 * (yz - wx),
         2 * (xz - wy), 2 * (yz + wx), 1 - 2 * (xx + yy)],
        axis=-1)
    return m.reshape(q.shape[:-1] + (3, 3))


def quaternion_raw_multiply(a: jax.Array, b: jax.Array) -> jax.Array:
    """Hamilton product, w-first, broadcasting over leading dims."""
    aw, ax, ay, az = a[..., 0], a[..., 1], a[..., 2], a[..., 3]
    bw, bx, by, bz = b[..., 0], b[..., 1], b[..., 2], b[..., 3]
    return jnp.stack([
        aw * bw - ax * bx - ay * by - az * bz,
        aw * bx + ax * bw + ay * bz - az * by,
        aw * by - ax * bz + ay * bw + az * bx,
        aw * bz + ax * by - ay * bx + az * bw,
    ], axis=-1)


def rotate_root_rotations(rotations: jax.Array, rot_quat: jax.Array) -> jax.Array:
    """rotations (B, T, J, 4), rot_quat (B, 4): left-multiply the ROOT joint quat.

    Plain jnp on purpose (perf review): ~16 flops per root element, and under
    jit XLA fuses it with the .at[...].set dynamic-update-slice into a single
    read+write pass over `rotations`.  A Pallas launch plus transposes/padding
    of the tiny (B, T, 4) slab would cost more than it saves.
    """
    root = rotations[:, :, 0, :].astype(jnp.float32)          # (B, T, 4)
    q = rot_quat.astype(jnp.float32)[:, None, :]              # (B, 1, 4)
    new_root = quaternion_raw_multiply(q, root).astype(rotations.dtype)
    return rotations.at[:, :, 0, :].set(new_root)


def generate_random_rotations(key, count: int, axis=(0.0, 1.0, 0.0)):
    """Mirrors Rotate.generate_random_rotations: random angle about `axis`."""
    # TODO(synk): exact angle distribution of get_random_rotation_around_axis is not in the
    # spec; uniform angle in [0, 2*pi) about the (normalized) axis is assumed.
    k_angle, k_axis = jax.random.split(key)
    if axis is None:
        ax = jax.random.normal(k_axis, (count, 3), jnp.float32)
    else:
        ax = jnp.broadcast_to(jnp.asarray(axis, jnp.float32), (count, 3))
    ax = ax / jnp.linalg.norm(ax, axis=-1, keepdims=True)
    angle = jax.random.uniform(k_angle, (count,), jnp.float32, 0.0, 2.0 * jnp.pi)
    half = 0.5 * angle
    quat = jnp.concatenate([jnp.cos(half)[:, None], jnp.sin(half)[:, None] * ax], axis=-1)
    return quaternion_to_matrix(quat), quat  # (B, 3, 3), (B, 4)


def batch_rotate(batch: dict, key, axis=(0.0, 1.0, 0.0)) -> dict:
    """Mirrors BatchRotate.forward (randomness via an explicit JAX key)."""
    positions = batch["joint_positions"]
    rotations = batch["joint_rotations"]
    B = positions.shape[0]
    rot_mat, rot_quat = generate_random_rotations(key, B, axis)
    out = dict(batch)
    out["joint_positions"] = rotate_positions(positions, rot_mat)
    out["joint_rotations"] = rotate_root_rotations(rotations, rot_quat)
    return out


@jax.jit
def _apply(positions, rotations, rot_mat, rot_quat):
    return (rotate_positions(positions, rot_mat),
            rotate_root_rotations(rotations, rot_quat))


# ----------------------------------------------------------------------------
# NumPy reference (mirrors the PyTorch module given the same rot_mat / rot_quat)
# ----------------------------------------------------------------------------
def _reference(positions, rotations, rot_mat, rot_quat):
    new_pos = np.einsum("bij,btkj->btki", rot_mat, positions)
    new_rot = rotations.copy()
    a = rot_quat                 # (B, 4)
    b = rotations[:, :, 0, :]    # (B, T, 4)
    aw, ax, ay, az = (a[:, None, i] for i in range(4))
    bw, bx, by, bz = (b[..., i] for i in range(4))
    ow = aw * bw - ax * bx - ay * by - az * bz
    ox = aw * bx + ax * bw + ay * bz - az * by
    oy = aw * by - ax * bz + ay * bw + az * bx
    oz = aw * bz + ax * by - ay * bx + az * bw
    new_rot[:, :, 0, :] = np.stack([ow, ox, oy, oz], axis=-1)
    return new_pos, new_rot


def _run_case(key, B, T, J):
    k_pos, k_rot, k_rng = jax.random.split(key, 3)
    positions = jax.random.normal(k_pos, (B, T, J, 3), dtype=jnp.float32)
    rotations = jax.random.normal(k_rot, (B, T, J, 4), dtype=jnp.float32)
    rotations = rotations / jnp.linalg.norm(rotations, axis=-1, keepdims=True)

    rot_mat, rot_quat = generate_random_rotations(k_rng, B)
    new_pos, new_rot = _apply(positions, rotations, rot_mat, rot_quat)
    jax.block_until_ready((new_pos, new_rot))

    ref_pos, ref_rot = _reference(np.asarray(positions), np.asarray(rotations),
                                  np.asarray(rot_mat), np.asarray(rot_quat))
    np.testing.assert_allclose(np.asarray(new_pos), ref_pos, rtol=1e-5, atol=1e-5)
    np.testing.assert_allclose(np.asarray(new_rot), ref_rot, rtol=1e-5, atol=1e-5)
    return positions, rotations, k_rng, ref_pos, ref_rot


if __name__ == "__main__":
    key = jax.random.PRNGKey(0)
    k_main, k_odd = jax.random.split(key)

    # Primary small case (nb_joints = 8): N = T*J*3 = 384 -> no padding path.
    positions, rotations, k_rng, ref_pos, ref_rot = _run_case(k_main, B=2, T=16, J=8)

    # Module-style entry point with the same key -> same random rotations.
    out_batch = batch_rotate(
        {"joint_positions": positions, "joint_rotations": rotations}, k_rng)
    jax.block_until_ready(out_batch["joint_positions"])
    np.testing.assert_allclose(np.asarray(out_batch["joint_positions"]), ref_pos,
                               rtol=1e-5, atol=1e-5)
    np.testing.assert_allclose(np.asarray(out_batch["joint_rotations"]), ref_rot,
                               rtol=1e-5, atol=1e-5)

    # Odd-shaped case (N = 105, not 128-aligned) exercises the padded fallback.
    _run_case(k_odd, B=3, T=5, J=7)

    print("KERNEL_OK")
</pallas_src>

<mosaic_0001>
module attributes {stable_mosaic.version = 11 : i64} {
  func.func @_rotate_xyz_kernel(%arg0: i32, %arg1: i32, %arg2: memref<2x9xf32, #tpu.memory_space<vmem>>, %arg3: memref<2x384xf32, #tpu.memory_space<vmem>>, %arg4: memref<2x384xf32, #tpu.memory_space<vmem>>) attributes {dimension_semantics = [#tpu.dimension_semantics<parallel>, #tpu.dimension_semantics<parallel>], iteration_bounds = array<i64: 1, 1>, scalar_prefetch = 0 : i64, scratch_operands = 0 : i64, tpu.core_type = #tpu.core_type<tc>, window_params = [{transform_indices = @transform_0, window_bounds = array<i64: 2, 9>}, {transform_indices = @transform_1, window_bounds = array<i64: 2, 384>}, {transform_indices = @transform_2, window_bounds = array<i64: 2, 384>}]} {
    %c0 = arith.constant 0 : index
    %c0_0 = arith.constant 0 : index
    %0 = vector.load %arg3[%c0, %c0_0] : memref<2x384xf32, #tpu.memory_space<vmem>>, vector<2x384xf32>
    %c0_1 = arith.constant 0 : index
    %c0_2 = arith.constant 0 : index
    %1 = vector.load %arg2[%c0_1, %c0_2] : memref<2x9xf32, #tpu.memory_space<vmem>>, vector<2x9xf32>
    %c1_i32 = arith.constant 1 : i32
    %2 = tpu.dynamic_rotate %0 by %c1_i32 dim 1 : vector<2x384xf32>, i32 -> vector<2x384xf32>
    %c2_i32 = arith.constant 2 : i32
    %3 = tpu.dynamic_rotate %0 by %c2_i32 dim 1 : vector<2x384xf32>, i32 -> vector<2x384xf32>
    %c383_i32 = arith.constant 383 : i32
    %4 = tpu.dynamic_rotate %0 by %c383_i32 dim 1 : vector<2x384xf32>, i32 -> vector<2x384xf32>
    %c382_i32 = arith.constant 382 : i32
    %5 = tpu.dynamic_rotate %0 by %c382_i32 dim 1 : vector<2x384xf32>, i32 -> vector<2x384xf32>
    %6 = tpu.iota {dimensions = array<i32: 1>} : vector<2x384xi32>
    %c3_i32 = arith.constant 3 : i32
    %c0_i32 = arith.constant 0 : i32
    %7 = arith.cmpi eq, %c3_i32, %c0_i32 : i32
    %c1_i32_3 = arith.constant 1 : i32
    %8 = arith.select %7, %c1_i32_3, %c3_i32 : i32
    %9 = vector.broadcast %8 : i32 to vector<2x384xi32>
    %10 = arith.remsi %6, %9 : vector<2x384xi32>
    %c0_i32_4 = arith.constant 0 : i32
    %11 = vector.broadcast %c0_i32_4 : i32 to vector<2x384xi32>
    %12 = arith.cmpi ne, %10, %11 : vector<2x384xi32>
    %c0_i32_5 = arith.constant 0 : i32
    %13 = vector.broadcast %c0_i32_5 : i32 to vector<2x384xi32>
    %14 = arith.cmpi slt, %10, %13 : vector<2x384xi32>
    %c0_i32_6 = arith.constant 0 : i32
    %15 = arith.cmpi slt, %8, %c0_i32_6 : i32
    %16 = vector.broadcast %15 : i1 to vector<2x384xi1>
    %17 = vector.broadcast %16 : vector<2x384xi1> to vector<2x384xi1>
    %18 = arith.xori %14, %17 : vector<2x384xi1>
    %19 = arith.andi %18, %12 : vector<2x384xi1>
    %20 = vector.broadcast %8 : i32 to vector<2x384xi32>
    %21 = arith.addi %10, %20 : vector<2x384xi32>
    %22 = arith.select %19, %21, %10 : vector<2x384xi1>, vector<2x384xi32>
    %c0_i32_7 = arith.constant 0 : i32
    %23 = vector.broadcast %c0_i32_7 : i32 to vector<2x384xi32>
    %24 = arith.cmpi eq, %22, %23 : vector<2x384xi32>
    %c1_i32_8 = arith.constant 1 : i32
    %25 = vector.broadcast %c1_i32_8 : i32 to vector<2x384xi32>
    %26 = arith.cmpi eq, %22, %25 : vector<2x384xi32>
    %27 = vector.extract_strided_slice %1 {offsets = [0, 0], sizes = [2, 1], strides = [1, 1]} : vector<2x9xf32> to vector<2x1xf32>
    %28 = vector.broadcast %27 : vector<2x1xf32> to vector<2x384xf32>
    %29 = arith.mulf %28, %0 : vector<2x384xf32>
    %30 = vector.extract_strided_slice %1 {offsets = [0, 1], sizes = [2, 1], strides = [1, 1]} : vector<2x9xf32> to vector<2x1xf32>
    %31 = vector.broadcast %30 : vector<2x1xf32> to vector<2x384xf32>
    %32 = arith.mulf %31, %4 : vector<2x384xf32>
    %33 = arith.addf %29, %32 : vector<2x384xf32>
    %34 = vector.extract_strided_slice %1 {offsets = [0, 2], sizes = [2, 1], strides = [1, 1]} : vector<2x9xf32> to vector<2x1xf32>
    %35 = vector.broadcast %34 : vector<2x1xf32> to vector<2x384xf32>
    %36 = arith.mulf %35, %5 : vector<2x384xf32>
    %37 = arith.addf %33, %36 : vector<2x384xf32>
    %38 = vector.extract_strided_slice %1 {offsets = [0, 3], sizes = [2, 1], strides = [1, 1]} : vector<2x9xf32> to vector<2x1xf32>
    %39 = vector.broadcast %38 : vector<2x1xf32> to vector<2x384xf32>
    %40 = arith.mulf %39, %2 : vector<2x384xf32>
    %41 = vector.extract_strided_slice %1 {offsets = [0, 4], sizes = [2, 1], strides = [1, 1]} : vector<2x9xf32> to vector<2x1xf32>
    %42 = vector.broadcast %41 : vector<2x1xf32> to vector<2x384xf32>
    %43 = arith.mulf %42, %0 : vector<2x384xf32>
    %44 = arith.addf %40, %43 : vector<2x384xf32>
    %45 = vector.extract_strided_slice %1 {offsets = [0, 5], sizes = [2, 1], strides = [1, 1]} : vector<2x9xf32> to vector<2x1xf32>
    %46 = vector.broadcast %45 : vector<2x1xf32> to vector<2x384xf32>
    %47 = arith.mulf %46, %4 : vector<2x384xf32>
    %48 = arith.addf %44, %47 : vector<2x384xf32>
    %49 = vector.extract_strided_slice %1 {offsets = [0, 6], sizes = [2, 1], strides = [1, 1]} : vector<2x9xf32> to vector<2x1xf32>
    %50 = vector.broadcast %49 : vector<2x1xf32> to vector<2x384xf32>
    %51 = arith.mulf %50, %3 : vector<2x384xf32>
    %52 = vector.extract_strided_slice %1 {offsets = [0, 7], sizes = [2, 1], strides = [1, 1]} : vector<2x9xf32> to vector<2x1xf32>
    %53 = vector.broadcast %52 : vector<2x1xf32> to vector<2x384xf32>
    %54 = arith.mulf %53, %2 : vector<2x384xf32>
    %55 = arith.addf %51, %54 : vector<2x384xf32>
    %56 = vector.extract_strided_slice %1 {offsets = [0, 8], sizes = [2, 1], strides = [1, 1]} : vector<2x9xf32> to vector<2x1xf32>
    %57 = vector.broadcast %56 : vector<2x1xf32> to vector<2x384xf32>
    %58 = arith.mulf %57, %0 : vector<2x384xf32>
    %59 = arith.addf %55, %58 : vector<2x384xf32>
    %60 = arith.select %26, %48, %59 : vector<2x384xi1>, vector<2x384xf32>
    %61 = arith.select %24, %37, %60 : vector<2x384xi1>, vector<2x384xf32>
    %c0_9 = arith.constant 0 : index
    %c0_10 = arith.constant 0 : index
    %62 = vector.load %arg4[%c0_9, %c0_10] : memref<2x384xf32, #tpu.memory_space<vmem>>, vector<2x384xf32>
    tpu.vector_store %arg4[%c0_9, %c0_10], %61 {strides = array<i32>} : memref<2x384xf32, #tpu.memory_space<vmem>>, vector<2x384xf32>,
    return
  }
  func.func @transform_0(%arg0: i32, %arg1: i32) -> (i32, i32) {
    %c0_i32 = arith.constant 0 : i32
    %c0_i32_0 = arith.constant 0 : i32
    return %arg0, %c0_i32 : i32, i32
  }
  func.func @transform_1(%arg0: i32, %arg1: i32) -> (i32, i32) {
    %c0_i32 = arith.constant 0 : i32
    return %arg0, %arg1 : i32, i32
  }
  func.func @transform_2(%arg0: i32, %arg1: i32) -> (i32, i32) {
    %c0_i32 = arith.constant 0 : i32
    return %arg0, %arg1 : i32, i32
  }
}

</mosaic_0001>

<bundles_post_ra>
// kernel: _apply.1
= control target key start
LH: loop header
LB: loop body
LE: loop exit
PB: predicated region body
PF: predicated region fallthrough
CT: control target
= control target key end

     0   :  { %v275_v0 = vmov 6   ;;  %v276_v1 = vmov 3   ;;  %v277_v3 = vmov 1983009808   ;;  %v18_v5 = vlaneseq  ;;  %s287_s13 = smov 127   ;;  %s288_s14 = smov 126   ;;  %s451_s0 = inlined_call_operand.vmem [shape: f32[2,9], index: 0, kind: input, shape index: {}]   ;;  %s452_s1 = inlined_call_operand.vmem [shape: f32[2,384], index: 1, kind: input, shape index: {}]   ;;  %s453_s2 = inlined_call_operand.vmem [shape: f32[2,384], index: 2, kind: output, shape index: {}]  }
   0x1   :  { %266 = vset.pattern.permute.xlu1 %v275_v0  ;;  %264 = vset.pattern.permute.xlu0 %v276_v1  ;;  %v12_v2 = vld [vmem:[%s451_s0] sm:$0x3]  ;;  %v16_v4 = vunpack.c.l.s4 %v277_v3  ;;  %v278_v6 = vmov 7   ;;  %v279_v7 = vmov 4   ;;  %v280_v11 = vmov 0   ;;  %s285_s0 = smov 1  }
   0x2   :  { %187 = vperm.xlu1 %266, %v12_v2   ;;  %160 = vperm.xlu0 %264, %v12_v2   ;;  %v19_v9 = vshrl.u32 %v18_v5, 7  ;;  %v11_v10 = vld [vmem:[%s452_s1] sm:$0x3f]  ;;  %v281_v12 = vmov 1   ;;  %v282_v15 = vmov 5   ;;  %v283_v16 = vmov 2  }
   0x3   :  { %v17_v8 = vunpack.c.0.s8 %v16_v4  ;;  %v14_v13 = vcombine.high %v11_v10, %v11_v10  ;;  %v284_v19 = vmov 8   ;;  %s286_s1 = smov 2   ;;  %v338_v23 = vand.u32 127, %v18_v5 }
   0x5   :  { %v310_v14 = vsub.s32 %v17_v8, %v19_v9  ;;  %v76_v26 = vadd.s32 256, %v338_v23  ;;  %v75_v27 = vadd.s32 128, %v338_v23  ;;  %vm41_vm9 = vcmp.lt.s32.totalorder %v338_v23, 1 }
   0x6   :  { %267 = vset.pattern.permute.xlu1 %v278_v6  ;;  %265 = vset.pattern.permute.xlu0 %v279_v7  ;;  %v350_v32 = vmul.u32.u64.low 2863311531, %v338_v23  ;;  %v351_v33 = vmul.u32.u64.high 2863311531, %v338_v23, %v350_v32  ;;  %vm61_vm10 = vcmp.lt.s32.totalorder %v338_v23, 127  ;;  %vm51_vm11 = vcmp.lt.s32.totalorder %v338_v23, 2 }
   0x7   :  { %194 = vperm.xlu1 %267, %v12_v2   ;;  %167 = vperm.xlu0 %265, %v12_v2   ;;  %v313_v17 = vrot.slane %v11_v10, %v310_v14  ;;  %v316_v18 = vrot.slane %v14_v13, %v310_v14  ;;  %v344_v28 = vmul.u32.u64.low 2863311531, %v76_v26  ;;  %v345_v29 = vmul.u32.u64.high 2863311531, %v76_v26, %v344_v28 }
   0x8   :  { %v353_v34 = vmul.u32.u64.low 2863311531, %v75_v27  ;;  %v354_v35 = vmul.u32.u64.high 2863311531, %v75_v27, %v353_v34  ;;  %v83_v39 = vshrl.u32 %v351_v33, 1  ;;  %vm71_vm12 = vcmp.lt.s32.totalorder %v338_v23, 126 }
   0x9   :  { %v321_v20 = vcombine.high %v313_v17, %v313_v17  ;;  %v105_v38 = vshrl.u32 %v345_v29, 1 }
   0xa   :  { %v94_v40 = vshrl.u32 %v354_v35, 1  ;;  %v84_v44 = vmul.u32 3, %v83_v39 }
   0xb   :  { %268 = vset.pattern.permute.xlu1 %v280_v11  ;;  %269 = vset.pattern.permute.xlu0 %v281_v12  ;;  %v106_v43 = vmul.u32 3, %v105_v38 }
   0xc   :  { %133 = vperm.xlu1 %268, %v12_v2   ;;  %140 = vperm.xlu0 %269, %v12_v2   ;;  %v95_v45 = vmul.u32 3, %v94_v40  ;;  %v85_v49 = vsub.s32 %v338_v23, %v84_v44 }
   0xd   :  { %v107_v47 = vsub.s32 %v76_v26, %v106_v43 }
   0xe   :  { %v96_v50 = vsub.s32 %v75_v27, %v95_v45  ;;  %vm110_vm2 = vcmp.ne.s32.totalorder %v85_v49, 0  ;;  %vm113_vm3 = vcmp.lt.s32.totalorder %v85_v49, 0  ;;  %v119_v55 = vadd.s32 3, %v85_v49 }
   0xf   :  { %vm112_vm0 = vcmp.ne.s32.totalorder %v107_v47, 0  ;;  %vm115_vm1 = vcmp.lt.s32.totalorder %v107_v47, 0  ;;  %v121_v54 = vadd.s32 3, %v107_v47  ;;  %vm116_vm7 = vmand %vm113_vm3, %vm110_vm2 }
  0x10   :  { %270 = vset.pattern.permute.xlu1 %v282_v15  ;;  %272 = vset.pattern.permute.xlu0 %v283_v16  ;;  %vm111_vm4 = vcmp.ne.s32.totalorder %v96_v50, 0  ;;  %vm114_vm5 = vcmp.lt.s32.totalorder %v96_v50, 0  ;;  %vm118_vm6 = vmand %vm115_vm1, %vm112_vm0  ;;  %v120_v56 = vadd.s32 3, %v96_v50  ;;  %v373_v60 = vsel %vm116_vm7, %v119_v55, %v85_v49 }
  0x11   :  { %177 = vperm.xlu1 %270, %v12_v2   ;;  %150 = vperm.xlu0 %272, %v12_v2   ;;  %vm117_vm8 = vmand %vm114_vm5, %vm111_vm4  ;;  %v369_v58 = vsel %vm118_vm6, %v121_v54, %v107_v47  ;;  %vm128_vm14 = vcmp.eq.s32.totalorder %v373_v60, 1  ;;  %vm125_vm0 = vcmp.eq.s32.totalorder %v373_v60, 0 }
  0x12   :  { %v375_v61 = vsel %vm117_vm8, %v120_v56, %v96_v50  ;;  %vm130_vm13 = vcmp.eq.s32.totalorder %v369_v58, 1  ;;  %vm127_vm2 = vcmp.eq.s32.totalorder %v369_v58, 0 }
  0x13   :  { %vm129_vm15 = vcmp.eq.s32.totalorder %v375_v61, 1  ;;  %vm126_vm1 = vcmp.eq.s32.totalorder %v375_v61, 0 }
  0x15   :  { %271 = vset.pattern.permute.xlu1 %v284_v19  ;;  %37 = vrot.lane.b32.xlu0 %v316_v18, %s285_s0 }
  0x16   :  { %204 = vperm.xlu1 %271, %v12_v2   ;;  %273 = vset.pattern.permute.xlu0 %v284_v19 }
  0x19   :  { %47 = vrot.lane.b32.xlu0 %v321_v20, %s286_s1 }
  0x1a   :  { %33 = vrot.lane.b32.xlu1 %v313_v17, %s285_s0 }
  0x1d   :  { %55 = vrot.lane.b32.xlu0 %v313_v17, %s287_s13 }
  0x1e   :  { %35 = vrot.lane.b32.xlu1 %v321_v20, %s285_s0 }
  0x21   :  { %59 = vrot.lane.b32.xlu0 %v316_v18, %s287_s13 }
  0x22   :  { %45 = vrot.lane.b32.xlu1 %v313_v17, %s286_s1 }
  0x25   :  { %67 = vrot.lane.b32.xlu0 %v321_v20, %s288_s14 }
  0x26   :  { %49 = vrot.lane.b32.xlu1 %v316_v18, %s286_s1 }
  0x2a   :  { %57 = vrot.lane.b32.xlu1 %v321_v20, %s287_s13 }
  0x2e   :  { %65 = vrot.lane.b32.xlu1 %v313_v17, %s288_s14 }
  0x32   :  { %69 = vrot.lane.b32.xlu1 %v316_v18, %s288_s14 }
  0x81   :  { %v334_v21 = vpop.permute.xlu1 %187  ;;  %v336_v22 = vpop.permute.xlu0 %160 }
  0x86   :  { %v340_v24 = vpop.permute.xlu1 %194  ;;  %v168_v25 = vpop.permute.xlu0 %167 }
  0x87   :  { %v170_v62 = vmul.f32 %v168_v25, %v313_v17  ;;  %v171_v63 = vmul.f32 %v168_v25, %v321_v20  ;;  %v172_v0 = vmul.f32 %v168_v25, %v316_v18 }
  0x8b   :  { %v134_v30 = vpop.permute.xlu1 %133  ;;  %v347_v31 = vpop.permute.xlu0 %140 }
  0x8c   :  { %v136_v2 = vmul.f32 %v134_v30, %v313_v17  ;;  %v137_v6 = vmul.f32 %v134_v30, %v321_v20  ;;  %v138_v11 = vmul.f32 %v134_v30, %v316_v18 }
  0x90   :  { %v356_v36 = vpop.permute.xlu1 %177  ;;  %v358_v37 = vpop.permute.xlu0 %150 }
  0x94   :  { %v38_v41 = vpop.permute.xlu0 %37 }
  0x95   :  { %v363_v42 = vpop.permute.xlu1 %204 }
  0x96   :  { %v207_v12 = vmul.f32 %v363_v42, %v313_v17  ;;  %v209_v27 = vmul.f32 %v363_v42, %v316_v18 }
  0x98   :  { %v48_v48 = vpop.permute.xlu0 %47 }
  0x99   :  { %v34_v46 = vpop.permute.xlu1 %33 }
  0x9a   :  { %v44_v3 = vsel %vm41_vm9, %v38_v41, %v34_v46 }
  0x9b   :  { %v163_v16 = vmul.f32 %v336_v22, %v44_v3  ;;  %v197_v32 = vmul.f32 %v340_v24, %v44_v3 }
  0x9c   :  { %v56_v52 = vpop.permute.xlu0 %55 }
  0x9d   :  { %v36_v51 = vpop.permute.xlu1 %35  ;;  %v173_v40 = vadd.f32 %v170_v62, %v163_v16 }
  0x9e   :  { %v42_v4 = vsel %vm41_vm9, %v36_v51, %v38_v41  ;;  %v43_v5 = vsel %vm41_vm9, %v34_v46, %v36_v51 }
  0x9f   :  { %v164_v19 = vmul.f32 %v336_v22, %v43_v5  ;;  %v199_v25 = vmul.f32 %v340_v24, %v42_v4  ;;  %v165_v28 = vmul.f32 %v336_v22, %v42_v4  ;;  %v198_v18 = vmul.f32 %v340_v24, %v43_v5 }
  0xa0   :  { %v60_v1 = vpop.permute.xlu0 %59  ;;  %v208_v24 = vmul.f32 %v363_v42, %v321_v20 }
  0xa1   :  { %v46_v53 = vpop.permute.xlu1 %45  ;;  %v64_v13 = vsel %vm61_vm10, %v60_v1, %v56_v52  ;;  %v174_v41 = vadd.f32 %v171_v63, %v164_v19  ;;  %v175_v45 = vadd.f32 %v172_v0, %v165_v28 }
  0xa2   :  { %v53_v7 = vsel %vm51_vm11, %v46_v53, %v48_v48  ;;  %v145_v33 = vmul.f32 %v347_v31, %v64_v13  ;;  %v182_v46 = vmul.f32 %v356_v36, %v64_v13 }
  0xa3   :  { %v191_v29 = vmul.f32 %v334_v21, %v53_v7 }
  0xa4   :  { %v68_v26 = vpop.permute.xlu0 %67  ;;  %v148_v49 = vadd.f32 %v145_v33, %v138_v11  ;;  %v185_v62 = vadd.f32 %v182_v46, %v175_v45 }
  0xa5   :  { %v50_v57 = vpop.permute.xlu1 %49  ;;  %v201_v47 = vadd.f32 %v198_v18, %v191_v29 }
  0xa6   :  { %v52_v59 = vsel %vm51_vm11, %v48_v48, %v50_v57  ;;  %v54_v8 = vsel %vm51_vm11, %v50_v57, %v46_v53 }
  0xa7   :  { %v192_v9 = vmul.f32 %v334_v21, %v52_v59  ;;  %v190_v30 = vmul.f32 %v334_v21, %v54_v8  ;;  %v211_v20 = vadd.f32 %v208_v24, %v201_v47 }
  0xa9   :  { %v58_v10 = vpop.permute.xlu1 %57  ;;  %v202_v34 = vadd.f32 %v199_v25, %v192_v9  ;;  %v200_v48 = vadd.f32 %v197_v32, %v190_v30 }
  0xaa   :  { %v63_v15 = vsel %vm61_vm10, %v56_v52, %v58_v10  ;;  %v62_v17 = vsel %vm61_vm10, %v58_v10, %v60_v1 }
  0xab   :  { %v143_v35 = vmul.f32 %v347_v31, %v63_v15  ;;  %v180_v22 = vmul.f32 %v356_v36, %v63_v15  ;;  %v181_v39 = vmul.f32 %v356_v36, %v62_v17  ;;  %v144_v43 = vmul.f32 %v347_v31, %v62_v17 }
  0xac   :  { %v212_v50 = vadd.f32 %v209_v27, %v202_v34  ;;  %v210_v42 = vadd.f32 %v207_v12, %v200_v48 }
  0xad   :  { %v66_v38 = vpop.permute.xlu1 %65  ;;  %v146_v51 = vadd.f32 %v143_v35, %v136_v2  ;;  %v183_v53 = vadd.f32 %v180_v22, %v173_v40  ;;  %v184_v54 = vadd.f32 %v181_v39, %v174_v41  ;;  %v147_v56 = vadd.f32 %v144_v43, %v137_v6 }
  0xae   :  { %v73_v21 = vsel %vm71_vm12, %v66_v38, %v68_v26  ;;  %v215_v1 = vsel %vm130_vm13, %v185_v62, %v212_v50 }
  0xaf   :  { %v153_v44 = vmul.f32 %v358_v37, %v73_v21  ;;  %v213_v23 = vsel %vm128_vm14, %v183_v53, %v210_v42  ;;  %v214_v2 = vsel %vm129_vm15, %v184_v54, %v211_v20 }
  0xb1   :  { %v70_v52 = vpop.permute.xlu1 %69  ;;  %v156_v57 = vadd.f32 %v153_v44, %v146_v51 }
  0xb2   :  { %v72_v55 = vsel %vm71_vm12, %v68_v26, %v70_v52  ;;  %v74_v31 = vsel %vm71_vm12, %v70_v52, %v66_v38 }
  0xb3   :  { %v154_v36 = vmul.f32 %v358_v37, %v72_v55  ;;  %v155_v59 = vmul.f32 %v358_v37, %v74_v31  ;;  %v216_v3 = vsel %vm125_vm0, %v156_v57, %v213_v23 }
  0xb5   :  { %v157_v63 = vadd.f32 %v154_v36, %v147_v56  ;;  %v158_v0 = vadd.f32 %v155_v59, %v148_v49 }
  0xb7   :  { %v217_v37 = vsel %vm126_vm1, %v157_v63, %v214_v2  ;;  %v218_v4 = vsel %vm127_vm2, %v158_v0, %v215_v1 }
  0xb8   :  { %v222_v5 = vcombine.low %v216_v3, %v217_v37  ;;  %v236_v7 = vrot.slane %v218_v4, %v310_v14 }
  0xba   :  { %v229_v6 = vrot.slane %v222_v5, %v310_v14 }
  0xbc   :  { %v237_v58 = vcombine.low %v229_v6, %v236_v7 }
  0xbe   :  { %239 = vst [vmem:[%s453_s2] sm:$0x3f] %v237_v58 }

</bundles_post_ra>
